<compile_context>
chip_gen: v7x
topology: tpu7x:2x2x1
jax: 0.10.0
libtpu: 0.0.40
codegen_flags: <defaults>
</compile_context>

<pallas_src>
import functools
import math

import jax
import jax.numpy as jnp
from jax import lax
from jax.experimental import pallas as pl
from jax.experimental.pallas import tpu as pltpu


def _nt_xent_kernel(x_ref, y_ref, rstat_ref, cstat_ref, out_ref, denom_ref, *,
                    inv_t, eps, feat_dim, n_valid, tn, mask_cols):
    j = pl.program_id(1)
    nj = pl.num_programs(1)

    @pl.when(j == 0)
    def _():
        denom_ref[...] = jnp.zeros_like(denom_ref)

    # bf16 gram on the MXU (f32 accumulation):  gram[a,b] = x_a . y_b
    x = x_ref[...]                                   # (TM, D) bf16
    y = y_ref[...]                                   # (TN, D) bf16
    gram = lax.dot_general(x, y, (((1,), (1,)), ((), ())),
                           preferred_element_type=jnp.float32)   # (TM, TN) f32

    # dist2[a,b] = rstat[a] + cstat[b] - 2 * gram[a,b]
    #   rstat[a] = ||x_a||^2 + 2*eps*sum(x_a) + D*eps^2   (precomputed, f32)
    #   cstat[b] = ||y_b||^2 - 2*eps*sum(y_b)             (precomputed, f32)
    dist2 = rstat_ref[...] + cstat_ref[...] - 2.0 * gram

    # Fold 1/T in before the sqrt:  sqrt(d2)/T == sqrt(d2 * (1/T)^2).
    scaled = jnp.sqrt(jnp.maximum(dist2, 0.0) * (inv_t * inv_t))
    e = jnp.exp(scaled)                              # f32 EUP (binding unit)

    if mask_cols:
        # Zero the contribution of zero-padded columns (col index >= n_valid).
        col_ids = j * tn + lax.broadcasted_iota(jnp.int32, (1, tn), 1)
        e = jnp.where(col_ids < n_valid, e, 0.0)

    # Row-sum via a ones-vector matmul on the MXU (keeps the XLU free).
    ones_col = jnp.ones((tn, 1), dtype=jnp.float32)
    denom_ref[...] += lax.dot_general(e, ones_col, (((1,), (0,)), ((), ())),
                                      preferred_element_type=jnp.float32)

    @pl.when(j == nj - 1)
    def _():
        # The a==b entry (masked by negatives_mask in the reference) has the
        # constant distance eps*sqrt(D); subtract its exp analytically.
        diag_const = math.exp(eps * math.sqrt(feat_dim) * inv_t)
        out_ref[...] = jnp.log(denom_ref[...] - diag_const)


def _round_up(x, m):
    return ((x + m - 1) // m) * m


def _pow2_floor(x):
    p = 1
    while p * 2 <= x:
        p *= 2
    return p


def _plan_tiles(n, tm=None, tn=None):
    """Pick (n_pad, tm, tn) satisfying Mosaic block-layout constraints.

    Full-extent blocks are always legal; otherwise tm is a multiple of 16
    (bf16 sublane packing), tn a multiple of 128 (lane width), and n_pad is a
    multiple of both so blocks tile the arrays exactly.  Padded columns are
    masked inside the kernel; padded rows are dropped in the wrapper.
    """
    n8 = _round_up(n, 8)
    if tm is None:
        tm = n8 if n8 <= 512 else 512
    if tn is None:
        tn = n8 if n8 <= 512 else 256
    if tm >= n8 and tn >= n8:
        if n8 >= 256 and n8 % 32 == 0:
            return n8, n8 // 2, n8      # two row tiles -> feeds both megacores
        return n8, n8, n8               # single full-extent tile
    tm = min(_pow2_floor(max(tm, 16)), 1024)
    tn = min(_pow2_floor(max(tn, 128)), 1024)
    n_pad = _round_up(n8, max(tm, tn))
    return n_pad, tm, tn


def contrastive_loss(emb_i, emb_j, temperature=0.5, eps=1e-6, tm=None, tn=None):
    """emb_i, emb_j: (B, D) arrays. Returns the scalar f32 NT-Xent loss."""
    b, d = emb_i.shape
    n = 2 * b
    inv_t = 1.0 / float(temperature)

    rep = jnp.concatenate([emb_i, emb_j], axis=0).astype(jnp.float32)      # (2B, D)
    # Positive partner of row a is row (a + B) mod 2B == swapped-order concat.
    rep_pos = jnp.concatenate([emb_j, emb_i], axis=0).astype(jnp.float32)  # (2B, D)

    # O(N*D) statistics, computed once and exactly in f32 (wrapper-side):
    sq = jnp.sum(rep * rep, axis=1, keepdims=True)                         # (N, 1)
    s1 = jnp.sum(rep, axis=1, keepdims=True)                               # (N, 1)
    row_stats = sq + 2.0 * eps * s1 + d * eps * eps                        # (N, 1)
    col_stats = (sq - 2.0 * eps * s1).reshape(1, n)                        # (1, N)

    # Exact positive distances (only O(N*D)); not needed inside the kernel.
    pdiff = rep - rep_pos + eps
    pos_dist = jnp.sqrt(jnp.sum(pdiff * pdiff, axis=1))                    # (N,)

    n_pad, tm, tn = _plan_tiles(n, tm, tn)
    pad = n_pad - n

    rep_bf = rep.astype(jnp.bfloat16)          # halves HBM/VMEM for the streams
    if pad:
        rep_bf = jnp.pad(rep_bf, ((0, pad), (0, 0)))
        row_stats = jnp.pad(row_stats, ((0, pad), (0, 0)))
        col_stats = jnp.pad(col_stats, ((0, 0), (0, pad)))

    kernel = functools.partial(
        _nt_xent_kernel,
        inv_t=inv_t,
        eps=float(eps),
        feat_dim=d,
        n_valid=n,
        tn=tn,
        mask_cols=(n_pad > n),
    )

    log_denom = pl.pallas_call(
        kernel,
        out_shape=jax.ShapeDtypeStruct((n_pad, 1), jnp.float32),
        grid=(n_pad // tm, n_pad // tn),
        in_specs=[
            pl.BlockSpec((tm, d), lambda i, j: (i, 0)),    # row tile of rep (bf16)
            pl.BlockSpec((tn, d), lambda i, j: (j, 0)),    # column tile of rep (bf16)
            pl.BlockSpec((tm, 1), lambda i, j: (i, 0)),    # row statistics (f32)
            pl.BlockSpec((1, tn), lambda i, j: (0, j)),    # column statistics (f32)
        ],
        out_specs=pl.BlockSpec((tm, 1), lambda i, j: (i, 0)),
        scratch_shapes=[pltpu.VMEM((tm, 1), jnp.float32)],
        compiler_params=pltpu.CompilerParams(
            dimension_semantics=("parallel", "arbitrary"),
            vmem_limit_bytes=48 * 1024 * 1024),
    )(rep_bf, rep_bf, row_stats, col_stats)

    # -log(exp(pos/T) / denom) = log(denom) - pos/T ; mean over the 2B rows.
    per_row = log_denom[:n, 0] - pos_dist * inv_t
    return jnp.sum(per_row) / n


def _reference(emb_i, emb_j, temperature=0.5, eps=1e-6):
    """Pure-JAX mirror of the PyTorch forward, for correctness checking."""
    rep = jnp.concatenate([emb_i, emb_j], axis=0).astype(jnp.float32)
    b = emb_i.shape[0]
    n = rep.shape[0]
    diff = rep[:, None, :] - rep[None, :, :] + eps
    dist = jnp.sqrt(jnp.sum(diff * diff, axis=2))
    positives = jnp.concatenate(
        [jnp.diagonal(dist, offset=b), jnp.diagonal(dist, offset=-b)], axis=0)
    neg_mask = 1.0 - jnp.eye(n, dtype=jnp.float32)
    denom = jnp.sum(neg_mask * jnp.exp(dist / temperature), axis=1)
    loss_partial = -jnp.log(jnp.exp(positives / temperature) / denom)
    return jnp.sum(loss_partial) / n


if __name__ == "__main__":
    TEMPERATURE = 0.5
    key = jax.random.PRNGKey(0)
    k1, k2, k3, k4, k5, k6 = jax.random.split(key, 6)

    # Case 1: module-style small shapes (batch_size=4, temperature=0.5), D=32.
    B, D = 4, 32
    emb_i = jax.random.normal(k1, (B, D), dtype=jnp.float32)
    emb_j = jax.random.normal(k2, (B, D), dtype=jnp.float32)
    loss = jax.block_until_ready(contrastive_loss(emb_i, emb_j, TEMPERATURE))
    ref = _reference(emb_i, emb_j, TEMPERATURE)
    assert jnp.allclose(loss, ref, rtol=1e-3, atol=1e-4), (loss, ref)

    # Case 2: multi-tile grid (2, 2) -> exercises cross-column-tile denominator
    # accumulation and the megacore-parallel row axis.
    B2, D2 = 128, 64
    emb_i2 = jax.random.normal(k3, (B2, D2), dtype=jnp.float32)
    emb_j2 = jax.random.normal(k4, (B2, D2), dtype=jnp.float32)
    loss2 = jax.block_until_ready(
        contrastive_loss(emb_i2, emb_j2, TEMPERATURE, tm=128, tn=128))
    ref2 = _reference(emb_i2, emb_j2, TEMPERATURE)
    assert jnp.allclose(loss2, ref2, rtol=1e-3, atol=1e-4), (loss2, ref2)

    # Case 3: awkward batch (N = 100 -> padded to 104) -> exercises the padded
    # column masking path.
    B3, D3 = 50, 48
    emb_i3 = jax.random.normal(k5, (B3, D3), dtype=jnp.float32)
    emb_j3 = jax.random.normal(k6, (B3, D3), dtype=jnp.float32)
    loss3 = jax.block_until_ready(contrastive_loss(emb_i3, emb_j3, TEMPERATURE))
    ref3 = _reference(emb_i3, emb_j3, TEMPERATURE)
    assert jnp.allclose(loss3, ref3, rtol=1e-3, atol=1e-4), (loss3, ref3)

    print("KERNEL_OK")
</pallas_src>

<mosaic_0001>
module attributes {stable_mosaic.version = 11 : i64} {
  func.func @_nt_xent_kernel(%arg0: i32, %arg1: i32, %arg2: memref<8x32xbf16, #tpu.memory_space<vmem>>, %arg3: memref<8x32xbf16, #tpu.memory_space<vmem>>, %arg4: memref<8x1xf32, #tpu.memory_space<vmem>>, %arg5: memref<1x8xf32, #tpu.memory_space<vmem>>, %arg6: memref<8x1xf32, #tpu.memory_space<vmem>>, %arg7: memref<8x1xf32, #tpu.memory_space<vmem>>) attributes {dimension_semantics = [#tpu.dimension_semantics<parallel>, #tpu.dimension_semantics<arbitrary>], iteration_bounds = array<i64: 1, 1>, scalar_prefetch = 0 : i64, scratch_operands = 1 : i64, tpu.core_type = #tpu.core_type<tc>, window_params = [{transform_indices = @transform_0, window_bounds = array<i64: 8, 32>}, {transform_indices = @transform_1, window_bounds = array<i64: 8, 32>}, {transform_indices = @transform_2, window_bounds = array<i64: 8, 1>}, {transform_indices = @transform_3, window_bounds = array<i64: 1, 8>}, {transform_indices = @transform_4, window_bounds = array<i64: 8, 1>}]} {
    %c0_i32 = arith.constant 0 : i32
    %0 = arith.cmpi eq, %arg1, %c0_i32 : i32
    %1 = arith.extui %0 : i1 to i32
    %c0_i32_0 = arith.constant 0 : i32
    %2 = arith.cmpi ne, %1, %c0_i32_0 : i32
    scf.if %2 {
      %cst_19 = arith.constant 0.000000e+00 : f32
      %28 = vector.broadcast %cst_19 : f32 to vector<8x1xf32>
      %c0_20 = arith.constant 0 : index
      %c0_21 = arith.constant 0 : index
      %29 = vector.load %arg7[%c0_20, %c0_21] : memref<8x1xf32, #tpu.memory_space<vmem>>, vector<8x1xf32>
      tpu.vector_store %arg7[%c0_20, %c0_21], %28 {strides = array<i32>} : memref<8x1xf32, #tpu.memory_space<vmem>>, vector<8x1xf32>,
    } else {
    }
    %c0 = arith.constant 0 : index
    %c0_1 = arith.constant 0 : index
    %3 = vector.load %arg2[%c0, %c0_1] : memref<8x32xbf16, #tpu.memory_space<vmem>>, vector<8x32xbf16>
    %c0_2 = arith.constant 0 : index
    %c0_3 = arith.constant 0 : index
    %4 = vector.load %arg3[%c0_2, %c0_3] : memref<8x32xbf16, #tpu.memory_space<vmem>>, vector<8x32xbf16>
    %cst = arith.constant dense<0.000000e+00> : vector<8x8xf32>
    %5 = tpu.matmul %3, %4, %cst {dimension_numbers = #tpu.dot_dimension_numbers<[1], [1], [0], [0], [0, 0, 1, 0], [], []>} : vector<8x32xbf16>, vector<8x32xbf16>, vector<8x8xf32> -> vector<8x8xf32>
    %c0_4 = arith.constant 0 : index
    %c0_5 = arith.constant 0 : index
    %6 = vector.load %arg4[%c0_4, %c0_5] : memref<8x1xf32, #tpu.memory_space<vmem>>, vector<8x1xf32>
    %c0_6 = arith.constant 0 : index
    %c0_7 = arith.constant 0 : index
    %7 = vector.load %arg5[%c0_6, %c0_7] : memref<1x8xf32, #tpu.memory_space<vmem>>, vector<1x8xf32>
    %8 = vector.broadcast %6 : vector<8x1xf32> to vector<8x8xf32>
    %9 = vector.broadcast %7 : vector<1x8xf32> to vector<8x8xf32>
    %10 = arith.addf %8, %9 : vector<8x8xf32>
    %cst_8 = arith.constant 2.000000e+00 : f32
    %11 = vector.broadcast %cst_8 : f32 to vector<8x8xf32>
    %12 = arith.mulf %11, %5 : vector<8x8xf32>
    %13 = arith.subf %10, %12 : vector<8x8xf32>
    %cst_9 = arith.constant 0.000000e+00 : f32
    %14 = vector.broadcast %cst_9 : f32 to vector<8x8xf32>
    %15 = arith.maximumf %13, %14 : vector<8x8xf32>
    %cst_10 = arith.constant 4.000000e+00 : f32
    %16 = vector.broadcast %cst_10 : f32 to vector<8x8xf32>
    %17 = arith.mulf %15, %16 : vector<8x8xf32>
    %18 = math.sqrt %17 : vector<8x8xf32>
    %19 = math.exp %18 : vector<8x8xf32>
    %cst_11 = arith.constant 1.000000e+00 : f32
    %20 = vector.broadcast %cst_11 : f32 to vector<8x1xf32>
    %c0_12 = arith.constant 0 : index
    %c0_13 = arith.constant 0 : index
    %21 = vector.load %arg7[%c0_12, %c0_13] : memref<8x1xf32, #tpu.memory_space<vmem>>, vector<8x1xf32>
    %cst_14 = arith.constant dense<0.000000e+00> : vector<8x1xf32>
    %22 = tpu.matmul %19, %20, %cst_14 {dimension_numbers = #tpu.dot_dimension_numbers<[1], [0], [0], [1], [0, 0, 1, 1], [], []>} : vector<8x8xf32>, vector<8x1xf32>, vector<8x1xf32> -> vector<8x1xf32>
    %23 = arith.addf %21, %22 : vector<8x1xf32>
    %c0_15 = arith.constant 0 : index
    %c0_16 = arith.constant 0 : index
    %24 = vector.load %arg7[%c0_15, %c0_16] : memref<8x1xf32, #tpu.memory_space<vmem>>, vector<8x1xf32>
    tpu.vector_store %arg7[%c0_15, %c0_16], %23 {strides = array<i32>} : memref<8x1xf32, #tpu.memory_space<vmem>>, vector<8x1xf32>,
    %c0_i32_17 = arith.constant 0 : i32
    %25 = arith.cmpi eq, %arg1, %c0_i32_17 : i32
    %26 = arith.extui %25 : i1 to i32
    %c0_i32_18 = arith.constant 0 : i32
    %27 = arith.cmpi ne, %26, %c0_i32_18 : i32
    scf.if %27 {
      %c0_19 = arith.constant 0 : index
      %c0_20 = arith.constant 0 : index
      %28 = vector.load %arg7[%c0_19, %c0_20] : memref<8x1xf32, #tpu.memory_space<vmem>>, vector<8x1xf32>
      %cst_21 = arith.constant 1.00001132 : f32
      %29 = vector.broadcast %cst_21 : f32 to vector<8x1xf32>
      %30 = arith.subf %28, %29 : vector<8x1xf32>
      %31 = math.log %30 : vector<8x1xf32>
      %c0_22 = arith.constant 0 : index
      %c0_23 = arith.constant 0 : index
      %32 = vector.load %arg6[%c0_22, %c0_23] : memref<8x1xf32, #tpu.memory_space<vmem>>, vector<8x1xf32>
      tpu.vector_store %arg6[%c0_22, %c0_23], %31 {strides = array<i32>} : memref<8x1xf32, #tpu.memory_space<vmem>>, vector<8x1xf32>,
    } else {
    }
    return
  }
  func.func @transform_0(%arg0: i32, %arg1: i32) -> (i32, i32) {
    %c0_i32 = arith.constant 0 : i32
    %c0_i32_0 = arith.constant 0 : i32
    return %arg0, %c0_i32 : i32, i32
  }
  func.func @transform_1(%arg0: i32, %arg1: i32) -> (i32, i32) {
    %c0_i32 = arith.constant 0 : i32
    %c0_i32_0 = arith.constant 0 : i32
    return %arg1, %c0_i32 : i32, i32
  }
  func.func @transform_2(%arg0: i32, %arg1: i32) -> (i32, i32) {
    %c0_i32 = arith.constant 0 : i32
    %c0_i32_0 = arith.constant 0 : i32
    return %arg0, %c0_i32 : i32, i32
  }
  func.func @transform_3(%arg0: i32, %arg1: i32) -> (i32, i32) {
    %c0_i32 = arith.constant 0 : i32
    %c0_i32_0 = arith.constant 0 : i32
    return %c0_i32, %arg1 : i32, i32
  }
  func.func @transform_4(%arg0: i32, %arg1: i32) -> (i32, i32) {
    %c0_i32 = arith.constant 0 : i32
    %c0_i32_0 = arith.constant 0 : i32
    return %arg0, %c0_i32 : i32, i32
  }
}

</mosaic_0001>

<bundles_post_ra>
// kernel: tpu_custom_call.1
= control target key start
LH: loop header
LB: loop body
LE: loop exit
PB: predicated region body
PF: predicated region fallthrough
CT: control target
= control target key end

     0   :  { %vm26_vm0 = vcmask 261120   ;;  %v220_v0 = vmov 0.0   ;;  %vm221_vm1 = vmmov 0   ;;  %v222_v4 = vmov 0   ;;  %s269_s1 = inlined_call_operand.vmem [shape: bf16[8,32], index: 1, kind: input, shape index: {}]   ;;  %s270_s2 = inlined_call_operand.vmem [shape: f32[8,1], index: 2, kind: input, shape index: {}]   ;;  %s271_s0 = inlined_call_operand.vmem [shape: bf16[8,32], index: 0, kind: input, shape index: {}]   ;;  %s272_s3 = inlined_call_operand.vmem [shape: f32[1,8], index: 3, kind: input, shape index: {}]   ;;  %s273_s4 = inlined_call_operand.vmem [shape: f32[8,1], index: 4, kind: output, shape index: {}]  }
   0x1   :  { %198 = vmatprep.subr.bf16.mxu0 %v220_v0  ;;  %v25_v1 = vld [vmem:[%s269_s1] sm:$0xf]  ;;  %200 = vmatprep.mubr.msk.bf16.mxu0 %vm221_vm1, %v220_v0  ;;  %v223_v6 = vmov 1.0   ;;  %vm22_vm2 = vcmask 7168   ;;  %vm101_vm5 = vcmask 64512  }
   0x2   :  { %v73_v2 = vld [vmem:[%s270_s2] sm:$0xff]  ;;  %v31_v3 = vsel %vm26_vm0, %v25_v1, 0  ;;  %213 = vset.pattern.permute.xlu0 %v222_v4  ;;  %204 = vmatprep.subr.mxu1 %v220_v0  ;;  %23 = vst.msk [vmem:[#allocation2] sm:$0xff] %vm22_vm2, %v220_v0 }
   0x3   :  { %199 = vmatpush3.bf16.xpose.msra.mxu0 %v31_v3  ;;  %77 = vperm.xlu0 %213, %v73_v2   ;;  %v24_v5 = vld [vmem:[%s271_s0] sm:$0xf] }
   0x4   :  { %206 = vmatprep.mubr.msk.f32.mxu1 %vm221_vm1, %v220_v0  ;;  %205 = vmatpush3.msra.mxu1 %v223_v6  ;;  %v191_v7 = vld [vmem:[%s272_s3] ss:$0 sm:$0xff] }
   0x9   :  { %v100_v25 = vld [vmem:[#allocation2] sm:$0xff] }
   0xa   :  { %201 = vmatmul.mubr.msk.bf16.vlgmr.msra.gmra.mrb[0].mxu0 %vm26_vm0, %v24_v5 }
  0x82   :  { %v78_v8 = vpop.permute.xlu0 %77 }
  0x83   :  { %v86_v9 = vadd.f32 %v191_v7, %v78_v8 }
  0xdd   :  { %v67_v10 = vpop.f32.mrb[0].mxu0 }
  0xde   :  { %v87_v11 = vmul.f32 2.0, %v67_v10  ;;  %v202_v12 = vpop.f32.mrb[1].mxu0 }
  0xdf   :  { %v70_v13 = vpop.f32.mrb[2].mxu0 }
  0xe0   :  { %v88_v14 = vsub.f32 %v86_v9, %v87_v11  ;;  %v203_v15 = vpop.f32.mrb[3].mxu0 }
  0xe2   :  { %v89_v16 = vmax.f32 %v88_v14, 0.0 }
  0xe4   :  { %v90_v17 = vmul.f32 4.0, %v89_v16 }
  0xe6   :  { %214 = vrsqrt.f32 %v90_v17  ;;  %vm93_vm3 = vcmp.eq.f32.partialorder %v90_v17, inf  ;;  %v96_v20 = vand.u32 2147483648, %v90_v17  ;;  %vm95_vm4 = vcmp.eq.f32.partialorder %v90_v17, 0.0 }
  0xf0   :  { %v215_v18 = vpop.eup %214 }
  0xf1   :  { %v92_v19 = vmul.f32 %v215_v18, %v90_v17 }
  0xf3   :  { %v94_v21 = vsel %vm93_vm3, %v90_v17, %v92_v19 }
  0xf4   :  { %v97_v22 = vsel %vm95_vm4, %v96_v20, %v94_v21 }
  0xf5   :  { %v98_v23 = vmul.f32 1.442695, %v97_v22 }
  0xf7   :  { %216 = vpow2.f32 %v98_v23 }
 0x101   :  { %v217_v24 = vpop.eup %216 }
 0x102   :  { %207 = vmatmul.mubr.msk.f32.vlgmr.msra.gmra.mrb[0].mxu1 %vm101_vm5, %v217_v24 }
 0x1d5   :  { %v171_v26 = vpop.f32.mrb[0].mxu1 }
 0x1d6   :  { %v175_v27 = vadd.f32 %v171_v26, %v100_v25  ;;  %v208_v28 = vpop.f32.mrb[1].mxu1 }
 0x1d8   :  { %177 = vst.msk [vmem:[#allocation2] sm:$0xff] %vm22_vm2, %v175_v27 }
 0x1df   :  { %v181_v29 = vld [vmem:[#allocation2] sm:$0xff] }
 0x1e0   :  { %v193_v30 = vadd.f32 -1.0000113, %v181_v29 }
 0x1e2   :  { %218 = vlog2.f32 %v193_v30 }
 0x1ec   :  { %v219_v31 = vpop.eup %218 }
 0x1ed   :  { %v184_v32 = vmul.f32 0.6931472, %v219_v31 }
 0x1ef   :  { %185 = vst.msk [vmem:[%s273_s4] sm:$0xff] %vm22_vm2, %v184_v32 }

</bundles_post_ra>
